<compile_context>
chip_gen: v7x
topology: tpu7x:2x2x1
jax: 0.10.0
libtpu: 0.0.40
codegen_flags: <defaults>
</compile_context>

<pallas_src>
import functools

import jax
import jax.numpy as jnp
from jax.experimental import pallas as pl
from jax.experimental.pallas import tpu as pltpu


def _vmem_specs(n):
    return [pl.BlockSpec(memory_space=pltpu.MemorySpace.VMEM) for _ in range(n)]


# ------------------------- fused Pallas kernel -------------------------

def _fused_gcn_kernel(
    x_ref, adj_ref, gx_ref,
    gc1_w, gc1_b, gc2_w, gc2_b,
    l1_w, l1_b, l2_w, l2_b,
    l3_w, l3_b, l4_w, l4_b,
    l5_w, l5_b, l6_w, l6_b,
    l7_w, l7_b,
    o_ref,
    *, out_channels,
):
    def dot(a, b):
        # keep f32 accumulation on every MXU op (no bf16 anywhere: fast path
        # on v5e, and at these K widths bf16 buys nothing on v6e/v7x).
        return jnp.dot(a, b, preferred_element_type=jnp.float32)

    # --- GraphConvolution 1: relu(adj @ (x @ W1) + b1) ---
    support = dot(x_ref[...], gc1_w[...])                 # (N, hid)
    h = dot(adj_ref[...], support) + gc1_b[...]
    h = jnp.maximum(h, 0.0)

    # --- GraphConvolution 2 fused with torch.max(x, dim=0).values ---
    support2 = dot(h, gc2_w[...])                         # (N, out_channels)
    g = dot(adj_ref[...], support2) + gc2_b[...]
    pooled = jnp.max(g, axis=0, keepdims=True)            # (1, out_channels)

    # --- graph-level MLP branch (all in-register (1, D) rows) ---
    gx = jnp.maximum(dot(gx_ref[...], l1_w[...]) + l1_b[...], 0.0)
    gx = jnp.maximum(dot(gx, l2_w[...]) + l2_b[...], 0.0)  # (1, out_channels)

    # --- concat([pooled, gx]) @ W3 expressed as split matmul ---
    w3_top = l3_w[0:out_channels, :]
    w3_bot = l3_w[out_channels:2 * out_channels, :]
    t = dot(pooled, w3_top) + dot(gx, w3_bot) + l3_b[...]
    t = jnp.maximum(t, 0.0)

    # TODO(synk): F.dropout(p, training=self.training) — inference mode assumed, identity.

    # --- tail MLP, all (1, D) activations kept in vregs ---
    t = jnp.maximum(dot(t, l4_w[...]) + l4_b[...], 0.0)
    t = jnp.maximum(dot(t, l5_w[...]) + l5_b[...], 0.0)
    t = jnp.maximum(dot(t, l6_w[...]) + l6_b[...], 0.0)
    t = dot(t, l7_w[...]) + l7_b[...]                      # (1, nclass)
    o_ref[...] = t.astype(o_ref.dtype)


# ------------------------- wrapper -------------------------

def gcn_forward(x, adj, graph_x, p):
    out_channels = p["gc2_w"].shape[1]
    nclass = p["l7_w"].shape[1]

    args = (
        x,
        adj,
        graph_x.reshape(1, -1),                 # torch.reshape(graph_x, (-1,))
        p["gc1_w"], p["gc1_b"].reshape(1, -1),
        p["gc2_w"], p["gc2_b"].reshape(1, -1),
        p["l1_w"], p["l1_b"].reshape(1, -1),
        p["l2_w"], p["l2_b"].reshape(1, -1),
        p["l3_w"], p["l3_b"].reshape(1, -1),
        p["l4_w"], p["l4_b"].reshape(1, -1),
        p["l5_w"], p["l5_b"].reshape(1, -1),
        p["l6_w"], p["l6_b"].reshape(1, -1),
        p["l7_w"], p["l7_b"].reshape(1, -1),
    )

    out = pl.pallas_call(
        functools.partial(_fused_gcn_kernel, out_channels=out_channels),
        out_shape=jax.ShapeDtypeStruct((1, nclass), jnp.float32),
        in_specs=_vmem_specs(len(args)),
        out_specs=pl.BlockSpec(memory_space=pltpu.MemorySpace.VMEM),
        compiler_params=pltpu.CompilerParams(vmem_limit_bytes=32 * 1024 * 1024),
    )(*args)
    return out.reshape(-1)                      # (nclass,)


# ------------------------- main -------------------------

if __name__ == "__main__":
    # module hyper-parameters (small, consistent with the forward)
    node_feat = 8
    graph_feat = 32
    graphConv_hid = 32
    MLP_hid = 32
    out_channels = 64      # must be divisible by 8 (out/2, out/4, out/8 layers)
    nclass = 4
    N = 16                 # number of graph nodes

    key = jax.random.PRNGKey(0)
    ks = jax.random.split(key, 24)

    def init(k, shape, scale=0.1):
        return jax.random.normal(k, shape, dtype=jnp.float32) * scale

    params = {
        "gc1_w": init(ks[0], (node_feat, graphConv_hid)),
        "gc1_b": init(ks[1], (graphConv_hid,)),
        "gc2_w": init(ks[2], (graphConv_hid, out_channels)),
        "gc2_b": init(ks[3], (out_channels,)),
        "l1_w": init(ks[4], (graph_feat, MLP_hid)),
        "l1_b": init(ks[5], (MLP_hid,)),
        "l2_w": init(ks[6], (MLP_hid, out_channels)),
        "l2_b": init(ks[7], (out_channels,)),
        "l3_w": init(ks[8], (out_channels * 2, out_channels)),
        "l3_b": init(ks[9], (out_channels,)),
        "l4_w": init(ks[10], (out_channels, out_channels // 2)),
        "l4_b": init(ks[11], (out_channels // 2,)),
        "l5_w": init(ks[12], (out_channels // 2, out_channels // 4)),
        "l5_b": init(ks[13], (out_channels // 4,)),
        "l6_w": init(ks[14], (out_channels // 4, out_channels // 8)),
        "l6_b": init(ks[15], (out_channels // 8,)),
        "l7_w": init(ks[16], (out_channels // 8, nclass)),
        "l7_b": init(ks[17], (nclass,)),
    }

    # example inputs
    x = jax.random.normal(ks[18], (N, node_feat), dtype=jnp.float32)
    adj_raw = jax.random.uniform(ks[19], (N, N), dtype=jnp.float32)
    adj = adj_raw / jnp.sum(adj_raw, axis=-1, keepdims=True)      # row-normalized adjacency
    graph_x = jax.random.normal(ks[20], (4, 8), dtype=jnp.float32)  # flattens to graph_feat=32

    out = gcn_forward(x, adj, graph_x, params)
    out = jax.block_until_ready(out)
    assert out.shape == (nclass,)
    print("KERNEL_OK")
</pallas_src>

<mosaic_0001>
module attributes {stable_mosaic.version = 11 : i64} {
  func.func @_fused_gcn_kernel(%arg0: memref<16x8xf32, #tpu.memory_space<vmem>>, %arg1: memref<16x16xf32, #tpu.memory_space<vmem>>, %arg2: memref<1x32xf32, #tpu.memory_space<vmem>>, %arg3: memref<8x32xf32, #tpu.memory_space<vmem>>, %arg4: memref<1x32xf32, #tpu.memory_space<vmem>>, %arg5: memref<32x64xf32, #tpu.memory_space<vmem>>, %arg6: memref<1x64xf32, #tpu.memory_space<vmem>>, %arg7: memref<32x32xf32, #tpu.memory_space<vmem>>, %arg8: memref<1x32xf32, #tpu.memory_space<vmem>>, %arg9: memref<32x64xf32, #tpu.memory_space<vmem>>, %arg10: memref<1x64xf32, #tpu.memory_space<vmem>>, %arg11: memref<128x64xf32, #tpu.memory_space<vmem>>, %arg12: memref<1x64xf32, #tpu.memory_space<vmem>>, %arg13: memref<64x32xf32, #tpu.memory_space<vmem>>, %arg14: memref<1x32xf32, #tpu.memory_space<vmem>>, %arg15: memref<32x16xf32, #tpu.memory_space<vmem>>, %arg16: memref<1x16xf32, #tpu.memory_space<vmem>>, %arg17: memref<16x8xf32, #tpu.memory_space<vmem>>, %arg18: memref<1x8xf32, #tpu.memory_space<vmem>>, %arg19: memref<8x4xf32, #tpu.memory_space<vmem>>, %arg20: memref<1x4xf32, #tpu.memory_space<vmem>>, %arg21: memref<1x4xf32, #tpu.memory_space<vmem>>) attributes {dimension_semantics = [], scalar_prefetch = 0 : i64, scratch_operands = 0 : i64, tpu.core_type = #tpu.core_type<tc>} {
    %c0 = arith.constant 0 : index
    %c0_0 = arith.constant 0 : index
    %0 = vector.load %arg0[%c0, %c0_0] : memref<16x8xf32, #tpu.memory_space<vmem>>, vector<16x8xf32>
    %c0_1 = arith.constant 0 : index
    %c0_2 = arith.constant 0 : index
    %1 = vector.load %arg3[%c0_1, %c0_2] : memref<8x32xf32, #tpu.memory_space<vmem>>, vector<8x32xf32>
    %cst = arith.constant dense<0.000000e+00> : vector<16x32xf32>
    %2 = tpu.matmul %0, %1, %cst {dimension_numbers = #tpu.dot_dimension_numbers<[1], [0], [0], [1], [0, 0, 1, 1], [], []>} : vector<16x8xf32>, vector<8x32xf32>, vector<16x32xf32> -> vector<16x32xf32>
    %c0_3 = arith.constant 0 : index
    %c0_4 = arith.constant 0 : index
    %3 = vector.load %arg1[%c0_3, %c0_4] : memref<16x16xf32, #tpu.memory_space<vmem>>, vector<16x16xf32>
    %cst_5 = arith.constant dense<0.000000e+00> : vector<16x32xf32>
    %4 = tpu.matmul %3, %2, %cst_5 {dimension_numbers = #tpu.dot_dimension_numbers<[1], [0], [0], [1], [0, 0, 1, 1], [], []>} : vector<16x16xf32>, vector<16x32xf32>, vector<16x32xf32> -> vector<16x32xf32>
    %c0_6 = arith.constant 0 : index
    %c0_7 = arith.constant 0 : index
    %5 = vector.load %arg4[%c0_6, %c0_7] : memref<1x32xf32, #tpu.memory_space<vmem>>, vector<1x32xf32>
    %6 = vector.broadcast %5 : vector<1x32xf32> to vector<16x32xf32>
    %7 = arith.addf %4, %6 : vector<16x32xf32>
    %cst_8 = arith.constant 0.000000e+00 : f32
    %8 = vector.broadcast %cst_8 : f32 to vector<16x32xf32>
    %9 = arith.maximumf %7, %8 : vector<16x32xf32>
    %c0_9 = arith.constant 0 : index
    %c0_10 = arith.constant 0 : index
    %10 = vector.load %arg5[%c0_9, %c0_10] : memref<32x64xf32, #tpu.memory_space<vmem>>, vector<32x64xf32>
    %cst_11 = arith.constant dense<0.000000e+00> : vector<16x64xf32>
    %11 = tpu.matmul %9, %10, %cst_11 {dimension_numbers = #tpu.dot_dimension_numbers<[1], [0], [0], [1], [0, 0, 1, 1], [], []>} : vector<16x32xf32>, vector<32x64xf32>, vector<16x64xf32> -> vector<16x64xf32>
    %c0_12 = arith.constant 0 : index
    %c0_13 = arith.constant 0 : index
    %12 = vector.load %arg1[%c0_12, %c0_13] : memref<16x16xf32, #tpu.memory_space<vmem>>, vector<16x16xf32>
    %cst_14 = arith.constant dense<0.000000e+00> : vector<16x64xf32>
    %13 = tpu.matmul %12, %11, %cst_14 {dimension_numbers = #tpu.dot_dimension_numbers<[1], [0], [0], [1], [0, 0, 1, 1], [], []>} : vector<16x16xf32>, vector<16x64xf32>, vector<16x64xf32> -> vector<16x64xf32>
    %c0_15 = arith.constant 0 : index
    %c0_16 = arith.constant 0 : index
    %14 = vector.load %arg6[%c0_15, %c0_16] : memref<1x64xf32, #tpu.memory_space<vmem>>, vector<1x64xf32>
    %15 = vector.broadcast %14 : vector<1x64xf32> to vector<16x64xf32>
    %16 = arith.addf %13, %15 : vector<16x64xf32>
    %cst_17 = arith.constant dense<0xFF800000> : vector<64xf32>
    %17 = vector.multi_reduction <maximumf>, %16, %cst_17 [0] : vector<16x64xf32> to vector<64xf32>
    %18 = vector.shape_cast %17 : vector<64xf32> to vector<1x64xf32>
    %c0_18 = arith.constant 0 : index
    %c0_19 = arith.constant 0 : index
    %19 = vector.load %arg2[%c0_18, %c0_19] : memref<1x32xf32, #tpu.memory_space<vmem>>, vector<1x32xf32>
    %c0_20 = arith.constant 0 : index
    %c0_21 = arith.constant 0 : index
    %20 = vector.load %arg7[%c0_20, %c0_21] : memref<32x32xf32, #tpu.memory_space<vmem>>, vector<32x32xf32>
    %cst_22 = arith.constant dense<0.000000e+00> : vector<1x32xf32>
    %21 = tpu.matmul %19, %20, %cst_22 {dimension_numbers = #tpu.dot_dimension_numbers<[1], [0], [0], [1], [0, 0, 1, 1], [], []>} : vector<1x32xf32>, vector<32x32xf32>, vector<1x32xf32> -> vector<1x32xf32>
    %c0_23 = arith.constant 0 : index
    %c0_24 = arith.constant 0 : index
    %22 = vector.load %arg8[%c0_23, %c0_24] : memref<1x32xf32, #tpu.memory_space<vmem>>, vector<1x32xf32>
    %23 = arith.addf %21, %22 : vector<1x32xf32>
    %cst_25 = arith.constant 0.000000e+00 : f32
    %24 = vector.broadcast %cst_25 : f32 to vector<1x32xf32>
    %25 = arith.maximumf %23, %24 : vector<1x32xf32>
    %c0_26 = arith.constant 0 : index
    %c0_27 = arith.constant 0 : index
    %26 = vector.load %arg9[%c0_26, %c0_27] : memref<32x64xf32, #tpu.memory_space<vmem>>, vector<32x64xf32>
    %cst_28 = arith.constant dense<0.000000e+00> : vector<1x64xf32>
    %27 = tpu.matmul %25, %26, %cst_28 {dimension_numbers = #tpu.dot_dimension_numbers<[1], [0], [0], [1], [0, 0, 1, 1], [], []>} : vector<1x32xf32>, vector<32x64xf32>, vector<1x64xf32> -> vector<1x64xf32>
    %c0_29 = arith.constant 0 : index
    %c0_30 = arith.constant 0 : index
    %28 = vector.load %arg10[%c0_29, %c0_30] : memref<1x64xf32, #tpu.memory_space<vmem>>, vector<1x64xf32>
    %29 = arith.addf %27, %28 : vector<1x64xf32>
    %cst_31 = arith.constant 0.000000e+00 : f32
    %30 = vector.broadcast %cst_31 : f32 to vector<1x64xf32>
    %31 = arith.maximumf %29, %30 : vector<1x64xf32>
    %c0_32 = arith.constant 0 : index
    %c0_33 = arith.constant 0 : index
    %32 = vector.load %arg11[%c0_32, %c0_33] : memref<128x64xf32, #tpu.memory_space<vmem>>, vector<64x64xf32>
    %c64 = arith.constant 64 : index
    %c0_34 = arith.constant 0 : index
    %33 = vector.load %arg11[%c64, %c0_34] : memref<128x64xf32, #tpu.memory_space<vmem>>, vector<64x64xf32>
    %cst_35 = arith.constant dense<0.000000e+00> : vector<1x64xf32>
    %34 = tpu.matmul %18, %32, %cst_35 {dimension_numbers = #tpu.dot_dimension_numbers<[1], [0], [0], [1], [0, 0, 1, 1], [], []>} : vector<1x64xf32>, vector<64x64xf32>, vector<1x64xf32> -> vector<1x64xf32>
    %cst_36 = arith.constant dense<0.000000e+00> : vector<1x64xf32>
    %35 = tpu.matmul %31, %33, %cst_36 {dimension_numbers = #tpu.dot_dimension_numbers<[1], [0], [0], [1], [0, 0, 1, 1], [], []>} : vector<1x64xf32>, vector<64x64xf32>, vector<1x64xf32> -> vector<1x64xf32>
    %36 = arith.addf %34, %35 : vector<1x64xf32>
    %c0_37 = arith.constant 0 : index
    %c0_38 = arith.constant 0 : index
    %37 = vector.load %arg12[%c0_37, %c0_38] : memref<1x64xf32, #tpu.memory_space<vmem>>, vector<1x64xf32>
    %38 = arith.addf %36, %37 : vector<1x64xf32>
    %cst_39 = arith.constant 0.000000e+00 : f32
    %39 = vector.broadcast %cst_39 : f32 to vector<1x64xf32>
    %40 = arith.maximumf %38, %39 : vector<1x64xf32>
    %c0_40 = arith.constant 0 : index
    %c0_41 = arith.constant 0 : index
    %41 = vector.load %arg13[%c0_40, %c0_41] : memref<64x32xf32, #tpu.memory_space<vmem>>, vector<64x32xf32>
    %cst_42 = arith.constant dense<0.000000e+00> : vector<1x32xf32>
    %42 = tpu.matmul %40, %41, %cst_42 {dimension_numbers = #tpu.dot_dimension_numbers<[1], [0], [0], [1], [0, 0, 1, 1], [], []>} : vector<1x64xf32>, vector<64x32xf32>, vector<1x32xf32> -> vector<1x32xf32>
    %c0_43 = arith.constant 0 : index
    %c0_44 = arith.constant 0 : index
    %43 = vector.load %arg14[%c0_43, %c0_44] : memref<1x32xf32, #tpu.memory_space<vmem>>, vector<1x32xf32>
    %44 = arith.addf %42, %43 : vector<1x32xf32>
    %cst_45 = arith.constant 0.000000e+00 : f32
    %45 = vector.broadcast %cst_45 : f32 to vector<1x32xf32>
    %46 = arith.maximumf %44, %45 : vector<1x32xf32>
    %c0_46 = arith.constant 0 : index
    %c0_47 = arith.constant 0 : index
    %47 = vector.load %arg15[%c0_46, %c0_47] : memref<32x16xf32, #tpu.memory_space<vmem>>, vector<32x16xf32>
    %cst_48 = arith.constant dense<0.000000e+00> : vector<1x16xf32>
    %48 = tpu.matmul %46, %47, %cst_48 {dimension_numbers = #tpu.dot_dimension_numbers<[1], [0], [0], [1], [0, 0, 1, 1], [], []>} : vector<1x32xf32>, vector<32x16xf32>, vector<1x16xf32> -> vector<1x16xf32>
    %c0_49 = arith.constant 0 : index
    %c0_50 = arith.constant 0 : index
    %49 = vector.load %arg16[%c0_49, %c0_50] : memref<1x16xf32, #tpu.memory_space<vmem>>, vector<1x16xf32>
    %50 = arith.addf %48, %49 : vector<1x16xf32>
    %cst_51 = arith.constant 0.000000e+00 : f32
    %51 = vector.broadcast %cst_51 : f32 to vector<1x16xf32>
    %52 = arith.maximumf %50, %51 : vector<1x16xf32>
    %c0_52 = arith.constant 0 : index
    %c0_53 = arith.constant 0 : index
    %53 = vector.load %arg17[%c0_52, %c0_53] : memref<16x8xf32, #tpu.memory_space<vmem>>, vector<16x8xf32>
    %cst_54 = arith.constant dense<0.000000e+00> : vector<1x8xf32>
    %54 = tpu.matmul %52, %53, %cst_54 {dimension_numbers = #tpu.dot_dimension_numbers<[1], [0], [0], [1], [0, 0, 1, 1], [], []>} : vector<1x16xf32>, vector<16x8xf32>, vector<1x8xf32> -> vector<1x8xf32>
    %c0_55 = arith.constant 0 : index
    %c0_56 = arith.constant 0 : index
    %55 = vector.load %arg18[%c0_55, %c0_56] : memref<1x8xf32, #tpu.memory_space<vmem>>, vector<1x8xf32>
    %56 = arith.addf %54, %55 : vector<1x8xf32>
    %cst_57 = arith.constant 0.000000e+00 : f32
    %57 = vector.broadcast %cst_57 : f32 to vector<1x8xf32>
    %58 = arith.maximumf %56, %57 : vector<1x8xf32>
    %c0_58 = arith.constant 0 : index
    %c0_59 = arith.constant 0 : index
    %59 = vector.load %arg19[%c0_58, %c0_59] : memref<8x4xf32, #tpu.memory_space<vmem>>, vector<8x4xf32>
    %cst_60 = arith.constant dense<0.000000e+00> : vector<1x4xf32>
    %60 = tpu.matmul %58, %59, %cst_60 {dimension_numbers = #tpu.dot_dimension_numbers<[1], [0], [0], [1], [0, 0, 1, 1], [], []>} : vector<1x8xf32>, vector<8x4xf32>, vector<1x4xf32> -> vector<1x4xf32>
    %c0_61 = arith.constant 0 : index
    %c0_62 = arith.constant 0 : index
    %61 = vector.load %arg20[%c0_61, %c0_62] : memref<1x4xf32, #tpu.memory_space<vmem>>, vector<1x4xf32>
    %62 = arith.addf %60, %61 : vector<1x4xf32>
    %c0_63 = arith.constant 0 : index
    %c0_64 = arith.constant 0 : index
    %63 = vector.load %arg21[%c0_63, %c0_64] : memref<1x4xf32, #tpu.memory_space<vmem>>, vector<1x4xf32>
    tpu.vector_store %arg21[%c0_63, %c0_64], %62 {strides = array<i32>} : memref<1x4xf32, #tpu.memory_space<vmem>>, vector<1x4xf32>,
    return
  }
}

</mosaic_0001>

<bundles_post_ra>
// kernel: tpu_custom_call.1
= control target key start
LH: loop header
LB: loop body
LE: loop exit
PB: predicated region body
PF: predicated region fallthrough
CT: control target
= control target key end

     0   :  { %s1748_s0 = inlined_call_operand.vmem [shape: f32[16,8], index: 0, kind: input, shape index: {}]   ;;  %s1749_s1 = inlined_call_operand.vmem [shape: f32[16,16], index: 1, kind: input, shape index: {}]   ;;  %s1750_s2 = inlined_call_operand.vmem [shape: f32[1,32], index: 2, kind: input, shape index: {}]   ;;  %s1751_s3 = inlined_call_operand.vmem [shape: f32[8,32], index: 3, kind: input, shape index: {}]   ;;  %s1752_s4 = inlined_call_operand.vmem [shape: f32[1,32], index: 4, kind: input, shape index: {}]   ;;  %s1753_s5 = inlined_call_operand.vmem [shape: f32[32,64], index: 5, kind: input, shape index: {}]   ;;  %s1754_s6 = inlined_call_operand.vmem [shape: f32[1,64], index: 6, kind: input, shape index: {}]   ;;  %s1755_s7 = inlined_call_operand.vmem [shape: f32[32,32], index: 7, kind: input, shape index: {}]   ;;  %s1756_s8 = inlined_call_operand.vmem [shape: f32[1,32], index: 8, kind: input, shape index: {}]   ;;  %s1757_s9 = inlined_call_operand.vmem [shape: f32[32,64], index: 9, kind: input, shape index: {}]   ;;  %s1758_s10 = inlined_call_operand.vmem [shape: f32[1,64], index: 10, kind: input, shape index: {}]   ;;  %s1759_s11 = inlined_call_operand.vmem [shape: f32[128,64], index: 11, kind: input, shape index: {}]   ;;  %s1760_s12 = inlined_call_operand.vmem [shape: f32[1,64], index: 12, kind: input, shape index: {}]   ;;  %s1761_s13 = inlined_call_operand.vmem [shape: f32[64,32], index: 13, kind: input, shape index: {}]   ;;  %s1762_s14 = inlined_call_operand.vmem [shape: f32[1,32], index: 14, kind: input, shape index: {}]   ;;  %s1763_s15 = inlined_call_operand.vmem [shape: f32[32,16], index: 15, kind: input, shape index: {}]   ;;  %s1764_s16 = inlined_call_operand.vmem [shape: f32[1,16], index: 16, kind: input, shape index: {}]   ;;  %s1765_s17 = inlined_call_operand.vmem [shape: f32[16,8], index: 17, kind: input, shape index: {}]   ;;  %s1766_s18 = inlined_call_operand.vmem [shape: f32[1,8], index: 18, kind: input, shape index: {}]   ;;  %s1767_s19 = inlined_call_operand.vmem [shape: f32[8,4], index: 19, kind: input, shape index: {}]   ;;  %s1768_s20 = inlined_call_operand.vmem [shape: f32[1,4], index: 20, kind: input, shape index: {}]   ;;  %s1769_s21 = inlined_call_operand.hbm [shape: f32[1,4], index: 21, kind: output, shape index: {}]  }
   0x1   :  { %1773 = sst [smem:[#allocation5_spill]] %s1748_s0 }
   0x2   :  { %1774 = sst [smem:[#allocation6_spill]] %s1749_s1 }
   0x3   :  { %1775 = sst [smem:[#allocation7_spill]] %s1750_s2 }
   0x4   :  { %1776 = sst [smem:[#allocation8_spill]] %s1751_s3 }
   0x5   :  { %1777 = sst [smem:[#allocation9_spill]] %s1752_s4 }
   0x6   :  { %1778 = sst [smem:[#allocation10_spill]] %s1753_s5 }
   0x7   :  { %1779 = sst [smem:[#allocation11_spill]] %s1764_s16 }
   0x8   :  { %s1780_s26 = sld [smem:[#allocation8_spill]]  ;;  %s1781_s16 = sld [smem:[#allocation5_spill]]  ;;  %vm72_vm0 = vcmask 64512  }
   0xe   :  { %v71_v0 = vld [vmem:[%s1780_s26] sm:$0xff]  ;;  %v70_v2 = vld [vmem:[%s1781_s16 + $0x8] sm:$0xff] }
   0xf   :  { %v69_v1 = vld [vmem:[%s1781_s16] sm:$0xff]  ;;  %1161 = vmatprep.subr.mxu0 %v71_v0 }
  0x10   :  { %1163 = vmatprep.mubr.msk.f32.mxu0 %vm72_vm0, %v69_v1 }
  0x11   :  { %26 = vsyncpa [#allocation3], 0  ;;  %1162 = vmatpush3.msra.mxu0 %v71_v0  ;;  %s1782_s30 = sld [smem:[#allocation6_spill]]  ;;  %vm163_vm1 = vcmask 130048   ;;  %s1783_s23 = sld [smem:[#allocation10_spill]]  ;;  %vm251_vm2 = vcmask 261120  }
  0x12   :  { %1164 = vmatmul.mubr.msk.f32.vlgmr.msra.gmra.mrb[0].mxu0 %vm72_vm0, %v70_v2  ;;  %s1784_s0 = sld [smem:[#allocation9_spill]]  ;;  %v1394_v21 = vmov 0.0|0.0   ;;  %vm1395_vm3 = vmmov 0   ;;  %v1396_v22 = vmov 0.0   ;;  %v426_v26 = vld [vmem:[%s1755_s7] sm:$0xff]  ;;  %v427_v27 = vld [vmem:[%s1755_s7 + $0x8] sm:$0xff] }
  0x13   :  { %v1310_v28 = vpack.c.bf16 %v427_v27, %v426_v26  ;;  %v428_v29 = vld [vmem:[%s1755_s7 + $0x10] sm:$0xff]  ;;  %v429_v30 = vld [vmem:[%s1755_s7 + $0x18] sm:$0xff]  ;;  %s1785_s26 = sld [smem:[#allocation7_spill]]  ;;  %v505_v33 = vld [vmem:[%s1757_s9] sm:$0xff]  ;;  %vm415_vm4 = vcmask 523264   ;;  %s1397_s7 = smov [#allocation2]  }
  0x14   :  { %v1313_v31 = vpack.c.bf16 %v429_v30, %v428_v29  ;;  %v506_v34 = vld [vmem:[%s1757_s9 + $0x8] sm:$0xff]  ;;  %v507_v36 = vld [vmem:[%s1757_s9 + $0x10] sm:$0xff]  ;;  %v508_v37 = vld [vmem:[%s1757_s9 + $0x18] sm:$0xff]  ;;  %s1071_s27 = sshll.u32 %s1397_s7, 4  ;;  %vm1063_vm5 = vcmask 24576   ;;  %s1072_s27 = int_to_ptr.vmem [resolvable:$true] %s1071_s27 }
  0x15   :  { %v1316_v35 = vpack.c.bf16 %v506_v34, %v505_v33  ;;  %v1319_v38 = vpack.c.bf16 %v508_v37, %v507_v36  ;;  %v592_v39 = vld [vmem:[%s1759_s11 + $0x40] sm:$0xff]  ;;  %v593_v40 = vld [vmem:[%s1759_s11 + $0x48] sm:$0xff]  ;;  %v594_v41 = vld [vmem:[%s1759_s11 + $0x50] sm:$0xff]  ;;  %p1375_p1 = scmp.lt.s32.totalorder %s1072_s27, %s1072_s27 }
  0x16   :  { %v1322_v42 = vpack.c.bf16 %v593_v40, %v592_v39  ;;  %v595_v43 = vld [vmem:[%s1759_s11 + $0x58] sm:$0xff]  ;;  %v596_v45 = vld [vmem:[%s1759_s11 + $0x60] sm:$0xff]  ;;  %v597_v46 = vld [vmem:[%s1759_s11 + $0x68] sm:$0xff] }
  0x17   :  { %v154_v3 = vld [vmem:[%s1782_s30] sm:$0xff]  ;;  %v248_v5 = vld [vmem:[%s1783_s23 + $0x8] sm:$0xff]  ;;  %v249_v11 = vld [vmem:[%s1783_s23 + $0x10] sm:$0xff]  ;;  %v1325_v44 = vpack.c.bf16 %v595_v43, %v594_v41  ;;  %v1328_v47 = vpack.c.bf16 %v597_v46, %v596_v45 }
  0x18   :  { %1170 = vmatprep.mubr.msk.f32.mxu1 %vm163_vm1, %v154_v3  ;;  %v247_v4 = vld [vmem:[%s1783_s23] sm:$0xff]  ;;  %v155_v10 = vld [vmem:[%s1782_s30 + $0x8] sm:$0xff]  ;;  %v250_v12 = vld [vmem:[%s1783_s23 + $0x18] sm:$0xff] }
  0x19   :  { %v1297_v6 = vpack.c.bf16 %v248_v5, %v247_v4  ;;  %v1301_v13 = vpack.c.bf16 %v250_v12, %v249_v11  ;;  %v1081_v14 = vld [vmem:[%s1784_s0] ss:$0 sm:$0xff]  ;;  %v585_v59 = vld [vmem:[%s1759_s11 + $0x8] sm:$0xff]  ;;  %v586_v2 = vld [vmem:[%s1759_s11 + $0x10] sm:$0xff] }
  0x1a   :  { %v425_v32 = vld [vmem:[%s1785_s26] sm:$0x1]  ;;  %v591_v11 = vld [vmem:[%s1759_s11 + $0x38] sm:$0xff]  ;;  %v754_v34 = vld [vmem:[%s1761_s13 + $0x28] sm:$0xff] }
  0x1b   :  { %1298 = vmatprep.subr.bf16.mxu0 %v1297_v6  ;;  %v1086_v48 = vld [vmem:[%s1754_s6] ss:$0 sm:$0xff]  ;;  %v752_v29 = vld [vmem:[%s1761_s13 + $0x18] sm:$0xff]  ;;  %v755_v36 = vld [vmem:[%s1761_s13 + $0x30] sm:$0xff] }
  0x1c   :  { %1300 = vmatpush3.bf16.msra.mxu0 %v1297_v6  ;;  %v430_v56 = vld [vmem:[%s1756_s8] sm:$0x1]  ;;  %v756_v37 = vld [vmem:[%s1761_s13 + $0x38] sm:$0xff]  ;;  %v833_v40 = vld [vmem:[%s1763_s15 + $0x8] sm:$0xff] }
  0x1d   :  { %1302 = vmatprep.subr.bf16.mxu0 %v1301_v13  ;;  %v584_v58 = vld [vmem:[%s1759_s11] sm:$0xff] }
  0x1e   :  { %v1334_v63 = vpack.c.bf16 %v585_v59, %v584_v58  ;;  %v588_v6 = vld [vmem:[%s1759_s11 + $0x20] sm:$0xff] }
  0x1f   :  { %v753_v33 = vld [vmem:[%s1761_s13 + $0x20] sm:$0xff] }
  0x20   :  { %1304 = vmatpush3.bf16.msra.mxu0 %v1301_v13  ;;  %v832_v39 = vld [vmem:[%s1763_s15] sm:$0xff] }
  0x21   :  { %1315 = vmatprep.subr.bf16.mxu0 %v1394_v21  ;;  %v1358_v41 = vpack.c.bf16 %v833_v40, %v832_v39  ;;  %v746_v43 = vld [vmem:[%s1760_s12] sm:$0x1] }
  0xe5   :  { %v1165_v7 = vpop.f32.mrb[0].mxu0 }
  0xe6   :  { %v145_v8 = vpop.f32.mrb[1].mxu0 }
  0xe7   :  { %v1293_v9 = vpack.c.bf16 %v1165_v7, %v145_v8  ;;  %v589_v7 = vld [vmem:[%s1759_s11 + $0x28] sm:$0xff] }
  0xe8   :  { %v1340_v8 = vpack.c.bf16 %v589_v7, %v588_v6 }
  0xe9   :  { %1294 = vmatprep.subr.bf16.mxu1 %v1293_v9 }
  0xea   :  { %1296 = vmatpush3.bf16.msra.mxu1 %v1293_v9 }
  0xed   :  { %1171 = vmatmul.mubr.msk.f32.vlgmr.msra.gmra.mrb[0].mxu1 %vm163_vm1, %v155_v10 }
  0xee   :  { %1188 = vmatprep.mubr.msk.f32.mxu1 %vm163_vm1, %v154_v3  ;;  %v587_v3 = vld [vmem:[%s1759_s11 + $0x18] sm:$0xff] }
  0xef   :  { %v1337_v4 = vpack.c.bf16 %v587_v3, %v586_v2 }
 0x1c0   :  { %v1172_v15 = vpop.f32.mrb[0].mxu1 }
 0x1c1   :  { %v242_v16 = vadd.f32 %v1172_v15, %v1081_v14  ;;  %v236_v17 = vpop.f32.mrb[1].mxu1  ;;  %v598_v15 = vld [vmem:[%s1759_s11 + $0x70] sm:$0xff] }
 0x1c2   :  { %v237_v18 = vadd.f32 %v1081_v14, %v236_v17 }
 0x1c3   :  { %v246_v20 = vmax.f32 %v242_v16, 0.0  ;;  %v599_v16 = vld [vmem:[%s1759_s11 + $0x78] sm:$0xff] }
 0x1c4   :  { %v245_v19 = vmax.f32 %v237_v18, 0.0  ;;  %v1331_v17 = vpack.c.bf16 %v599_v16, %v598_v15  ;;  %v509_v18 = vld [vmem:[%s1758_s10] sm:$0x1]  ;;  %s1786_s10 = sld [smem:[#allocation11_spill]] }
 0x1c6   :  { %1181 = vmatprep.mubr.msk.f32.mxu0 %vm251_vm2, %v245_v19  ;;  %v749_v19 = vld [vmem:[%s1761_s13] sm:$0xff] }
 0x1c7   :  { %1182 = vmatmul.mubr.msk.f32.vlgmr.msra.gmra.mrb[2].mxu0 %vm251_vm2, %v246_v20  ;;  %v750_v20 = vld [vmem:[%s1761_s13 + $0x8] sm:$0xff] }
 0x1c8   :  { %1210 = vmatprep.mubr.msk.f32.mxu0 %vm1395_vm3, %v1396_v22  ;;  %1317 = vmatpush3.bf16.msra.mxu0 %v1316_v35  ;;  %v1346_v26 = vpack.c.bf16 %v750_v20, %v749_v19  ;;  %v1352_v35 = vpack.c.bf16 %v754_v34, %v753_v33 }
 0x1c9   :  { %1318 = vmatprep.subr.bf16.mxu0 %v1394_v21 }
 0x1ca   :  { %v836_v58 = vld [vmem:[%s1786_s10] sm:$0x1] }
 0x1cc   :  { %1320 = vmatpush3.bf16.msra.mxu0 %v1319_v38  ;;  %v1355_v38 = vpack.c.bf16 %v756_v37, %v755_v36 }
 0x1cd   :  { %1333 = vmatprep.subr.bf16.mxu0 %v1394_v21 }
 0x29a   :  { %v1183_v23 = vpop.f32.mrb[2].mxu0 }
 0x29b   :  { %v324_v24 = vpop.f32.mrb[3].mxu0 }
 0x29c   :  { %v1305_v25 = vpack.c.bf16 %v1183_v23, %v324_v24 }
 0x29e   :  { %1306 = vmatprep.subr.bf16.mxu1 %v1305_v25 }
 0x29f   :  { %1308 = vmatpush3.bf16.msra.mxu1 %v1305_v25 }
 0x2a0   :  { %1309 = vmatprep.subr.bf16.mxu1 %v1394_v21 }
 0x2a2   :  { %1189 = vmatmul.mubr.msk.f32.vlgmr.msra.gmra.mrb[2].mxu1 %vm163_vm1, %v155_v10  ;;  %v590_v10 = vld [vmem:[%s1759_s11 + $0x30] sm:$0xff] }
 0x2a3   :  { %1311 = vmatpush3.bf16.msra.mxu1 %v1310_v28  ;;  %1199 = vmatprep.mubr.msk.f32.mxu1 %vm1395_vm3, %v1396_v22  ;;  %v1343_v12 = vpack.c.bf16 %v591_v11, %v590_v10  ;;  %v751_v28 = vld [vmem:[%s1761_s13 + $0x10] sm:$0xff] }
 0x2a4   :  { %1312 = vmatprep.subr.bf16.mxu1 %v1394_v21  ;;  %v1349_v30 = vpack.c.bf16 %v752_v29, %v751_v28 }
 0x2a7   :  { %1314 = vmatpush3.bf16.msra.mxu1 %v1313_v31 }
 0x2a8   :  { %1321 = vmatprep.subr.bf16.mxu1 %v1394_v21 }
 0x2aa   :  { %1200 = vmatmul.mubr.msk.f32.vlgmr.msra.gmra.mrb[4].mxu1 %vm251_vm2, %v425_v32 }
 0x2ab   :  { %1229 = vmatprep.mubr.msk.f32.mxu1 %vm1395_vm3, %v1396_v22  ;;  %1323 = vmatpush3.bf16.msra.mxu1 %v1322_v42 }
 0x2ac   :  { %1324 = vmatprep.subr.bf16.mxu1 %v1394_v21 }
 0x2af   :  { %1326 = vmatpush3.bf16.msra.mxu1 %v1325_v44 }
 0x2b0   :  { %1327 = vmatprep.subr.bf16.mxu1 %v1394_v21 }
 0x2b3   :  { %1329 = vmatpush3.bf16.msra.mxu1 %v1328_v47 }
 0x2b4   :  { %1330 = vmatprep.subr.bf16.mxu1 %v1394_v21 }
 0x2b7   :  { %1332 = vmatpush3.bf16.msra.mxu1 %v1331_v17 }
 0x2b8   :  { %1345 = vmatprep.subr.bf16.mxu1 %v1394_v21 }
 0x375   :  { %v1190_v49 = vpop.f32.mrb[2].mxu1 }
 0x376   :  { %v412_v50 = vadd.f32 %v1190_v49, %v1086_v48  ;;  %v406_v51 = vpop.f32.mrb[3].mxu1  ;;  %v835_v49 = vld [vmem:[%s1763_s15 + $0x18] sm:$0xff] }
 0x377   :  { %v407_v52 = vadd.f32 %v1086_v48, %v406_v51  ;;  %v834_v48 = vld [vmem:[%s1763_s15 + $0x10] sm:$0xff]  ;;  %v757_v51 = vld [vmem:[%s1762_s14] sm:$0x1] }
 0x378   :  { %v417_v53 = vsel %vm415_vm4, %v412_v50, -inf  ;;  %v1361_v50 = vpack.c.bf16 %v835_v49, %v834_v48 }
 0x379   :  { %v416_v54 = vsel %vm415_vm4, %v407_v52, -inf }
 0x37a   :  { %v418_v55 = vmax.f32 %v416_v54, %v417_v53 }
 0x37c   :  { %v419_v57 = vrot.slane %v418_v55, 4 }
 0x37d   :  { %v500_v60 = vpop.f32.mrb[4].mxu1 }
 0x37e   :  { %v501_v61 = vadd.f32 %v500_v60, %v430_v56  ;;  %v1201_v62 = vpop.f32.mrb[5].mxu1  ;;  %v420_v0 = vmax.f32 %v418_v55, %v419_v57  ;;  %v911_v56 = vld [vmem:[%s1765_s17] sm:$0xff] }
 0x380   :  { %v504_v1 = vmax.f32 %v501_v61, 0.0  ;;  %v421_v5 = vrot.slane %v420_v0, 2 }
 0x382   :  { %1211 = vmatmul.mubr.msk.f32.vlgmr.msra.gmra.mrb[4].mxu0 %vm251_vm2, %v504_v1  ;;  %v422_v9 = vmax.f32 %v420_v0, %v421_v5  ;;  %v913_v0 = vld [vmem:[%s1766_s18] sm:$0x1]  ;;  %s1374_s18 = scalar_lea.vmem %s1072_s27, 32 }
 0x383   :  { %1335 = vmatpush3.bf16.msra.mxu0 %v1334_v63  ;;  %1248 = vmatprep.mubr.msk.f32.mxu0 %vm1395_vm3, %v1396_v22  ;;  %v988_v63 = vld [vmem:[%s1767_s19] sm:$0xff]  ;;  %s1370_s19 = scalar_lea.vmem %s1072_s27, 16 }
 0x384   :  { %1336 = vmatprep.subr.bf16.mxu0 %v1394_v21  ;;  %v423_v13 = vrot.slane %v422_v9, 1  ;;  %v989_v5 = vld [vmem:[%s1768_s20] sm:$0x1]  ;;  %p1371_p0 = scmp.ne.s32.totalorder %s1072_s27, %s1370_s19  ;;  %p1376_p2 = scmp.lt.s32.totalorder %s1374_s18, %s1370_s19 }
 0x386   :  { %v424_v14 = vmax.f32 %v422_v9, %v423_v13  ;;  %p1377_p3 = por %p1376_p2, %p1375_p1 }
 0x387   :  { %1338 = vmatpush3.bf16.msra.mxu0 %v1337_v4 }
 0x388   :  { %1339 = vmatprep.subr.bf16.mxu0 %v1394_v21  ;;  %p1378_p4 = pnand %p1377_p3, %p1371_p0 }
 0x38b   :  { %1341 = vmatpush3.bf16.msra.mxu0 %v1340_v8 }
 0x38c   :  { %1342 = vmatprep.subr.bf16.mxu0 %v1394_v21 }
 0x38f   :  { %1344 = vmatpush3.bf16.msra.mxu0 %v1343_v12 }
 0x390   :  { %1357 = vmatprep.subr.bf16.mxu0 %v1394_v21 }
 0x392   :  { %1249 = vmatmul.mubr.msk.f32.vlgmr.msra.gmra.mrb[6].mxu0 %vm415_vm4, %v424_v14 }
 0x393   :  { %1278 = vmatprep.mubr.msk.f32.mxu0 %vm1395_vm3, %v1396_v22  ;;  %1359 = vmatpush3.bf16.msra.mxu0 %v1358_v41 }
 0x394   :  { %1360 = vmatprep.subr.bf16.mxu0 %v1394_v21 }
 0x397   :  { %1362 = vmatpush3.bf16.msra.mxu0 %v1361_v50 }
 0x398   :  { %1363 = vmatprep.subr.bf16.mxu0 %v1394_v21 }
 0x455   :  { %v579_v23 = vpop.f32.mrb[4].mxu0 }
 0x456   :  { %v580_v24 = vadd.f32 %v579_v23, %v509_v18  ;;  %v1212_v25 = vpop.f32.mrb[5].mxu0 }
 0x458   :  { %v583_v27 = vmax.f32 %v580_v24, 0.0 }
 0x45a   :  { %1230 = vmatmul.mubr.msk.f32.vlgmr.msra.gmra.mrb[6].mxu1 %vm415_vm4, %v583_v27 }
 0x45b   :  { %1347 = vmatpush3.bf16.msra.mxu1 %v1346_v26  ;;  %1267 = vmatprep.mubr.msk.f32.mxu1 %vm1395_vm3, %v1396_v22 }
 0x45c   :  { %1348 = vmatprep.subr.bf16.mxu1 %v1394_v21 }
 0x45f   :  { %1350 = vmatpush3.bf16.msra.mxu1 %v1349_v30 }
 0x460   :  { %1351 = vmatprep.subr.bf16.mxu1 %v1394_v21 }
 0x463   :  { %1353 = vmatpush3.bf16.msra.mxu1 %v1352_v35 }
 0x464   :  { %1354 = vmatprep.subr.bf16.mxu1 %v1394_v21  ;;  %v912_v21 = vld [vmem:[%s1765_s17 + $0x8] sm:$0xff] }
 0x465   :  { %v742_v31 = vpop.f32.mrb[6].mxu0  ;;  %v1364_v57 = vpack.c.bf16 %v912_v21, %v911_v56 }
 0x466   :  { %v1250_v32 = vpop.f32.mrb[7].mxu0 }
 0x467   :  { %1356 = vmatpush3.bf16.msra.mxu1 %v1355_v38 }
 0x52d   :  { %v669_v42 = vpop.f32.mrb[6].mxu1 }
 0x52e   :  { %v743_v44 = vadd.f32 %v742_v31, %v669_v42  ;;  %v1231_v45 = vpop.f32.mrb[7].mxu1 }
 0x530   :  { %v747_v46 = vadd.f32 %v746_v43, %v743_v44 }
 0x532   :  { %v748_v47 = vmax.f32 %v747_v46, 0.0 }
 0x534   :  { %1268 = vmatmul.mubr.msk.f32.vlgmr.msra.gmra.mrb[8].mxu1 %vm415_vm4, %v748_v47 }
 0x607   :  { %v827_v52 = vpop.f32.mrb[8].mxu1 }
 0x608   :  { %v828_v53 = vadd.f32 %v827_v52, %v757_v51  ;;  %v1269_v54 = vpop.f32.mrb[9].mxu1 }
 0x60a   :  { %v831_v55 = vmax.f32 %v828_v53, 0.0 }
 0x60c   :  { %1279 = vmatmul.mubr.msk.f32.vlgmr.msra.gmra.mrb[8].mxu0 %vm251_vm2, %v831_v55 }
 0x60d   :  { %1285 = vmatprep.mubr.msk.f32.mxu0 %vm1395_vm3, %v1396_v22  ;;  %1365 = vmatpush3.bf16.msra.mxu0 %v1364_v57 }
 0x60e   :  { %1288 = vmatprep.subr.mxu0 %v1396_v22 }
 0x6df   :  { %v906_v59 = vpop.f32.mrb[8].mxu0 }
 0x6e0   :  { %v907_v60 = vadd.f32 %v906_v59, %v836_v58  ;;  %v1280_v61 = vpop.f32.mrb[9].mxu0 }
 0x6e2   :  { %v910_v62 = vmax.f32 %v907_v60, 0.0 }
 0x6e4   :  { %1286 = vmatmul.mubr.msk.f32.vlgmr.msra.gmra.mrb[10].mxu0 %vm163_vm1, %v910_v62 }
 0x6e5   :  { %1290 = vmatprep.mubr.msk.f32.mxu0 %vm1395_vm3, %v1396_v22  ;;  %1289 = vmatpush3.msra.mxu0 %v988_v63 }
 0x7b7   :  { %v983_v1 = vpop.f32.mrb[10].mxu0 }
 0x7b8   :  { %v984_v2 = vadd.f32 %v983_v1, %v913_v0  ;;  %v1287_v3 = vpop.f32.mrb[11].mxu0 }
 0x7ba   :  { %v987_v4 = vmax.f32 %v984_v2, 0.0 }
 0x7bc   :  { %1291 = vmatmul.mubr.msk.f32.vlgmr.msra.gmra.mrb[12].mxu0 %vm72_vm0, %v987_v4 }
 0x88f   :  { %v1059_v22 = vpop.f32.mrb[12].mxu0 }
 0x890   :  { %v1060_v6 = vadd.f32 %v1059_v22, %v989_v5  ;;  %v1292_v7 = vpop.f32.mrb[13].mxu0 }
 0x892   :  { %1064 = vst.msk [vmem:[#allocation2] sm:$0x1] %vm1063_vm5, %v1060_v6 }
 0x893   :  { %1381 = shalt.err (!%p1378_p4)
}
 0x894   :  { %s1382_s20 = scalar_lea.hbm %s1769_s21, 16 }
 0x895   :  { %p1383_p5 = scmp.ne.s32.totalorder %s1769_s21, %s1382_s20  ;;  %p1386_p6 = scmp.lt.u32.totalorder %s1382_s20, %s1769_s21 }
 0x897   :  { %p1388_p7 = pnand %p1386_p6, %p1383_p5 }
 0x899   :  { %1391 = shalt.err (!%p1388_p7)
}
 0x89a   :  { %1074 = dma.vmem_to_hbm [thread:$0]  %s1072_s27, 16, %s1769_s21, [#allocation3]  }
 0x89b   :  { %1392 = dma.done.wait [#allocation3], 16  }
 0x89c   :  { %1393 = vsyncadd [#allocation3], 4294967280 }
 0x89d   :  { %1078 = vsyncpa [#allocation3], 1 }

</bundles_post_ra>
